<compile_context>
chip_gen: v7x
topology: tpu7x:2x2x1
jax: 0.10.0
libtpu: 0.0.40
codegen_flags: <defaults>
</compile_context>

<pallas_src>
import jax
import jax.numpy as jnp
from jax import lax
from jax.experimental import pallas as pl
from jax.experimental.pallas import tpu as pltpu


# ----------------------------- kernel bodies ------------------------------

def _encoder_ctx(patches_ref, cw_ref, cb_ref, fw_ref, fb_ref, B):
    """Conv-as-matmul + ReLU + pooling-matmul + FC.  Returns ctx value [B, HID]."""
    M = patches_ref.shape[0]
    P = M // B                                                     # spatial positions / batch

    # single well-shaped MXU matmul (M rows) for the 3x3 conv
    feat = jnp.maximum(
        jnp.dot(patches_ref[...], cw_ref[...], preferred_element_type=jnp.float32)
        + cb_ref[...], 0.0)                                        # [M, Cout]

    # global average pool as a matmul (MXU is idle; avoids reshape relayout + XLU reduce)
    rows = lax.broadcasted_iota(jnp.int32, (B, M), 0)
    cols = lax.broadcasted_iota(jnp.int32, (B, M), 1)
    pool = jnp.where((cols >= rows * P) & (cols < (rows + 1) * P),
                     jnp.float32(1.0 / P), jnp.float32(0.0))       # [B, M]
    pooled = jnp.dot(pool, feat, preferred_element_type=jnp.float32)   # [B, Cout]

    return (jnp.dot(pooled, fw_ref[...], preferred_element_type=jnp.float32)
            + fb_ref[...])                                         # [B, HID]


def fused_tf_kernel(patches_ref, cw_ref, cb_ref, fw_ref, fb_ref,
                    ids_ref, weff_ref, whh_ref, bh_ref, wout_ref, bout_ref,
                    out_ref):
    # Teacher-forced encoder+decoder.
    # ids_ref: VMEM [T*B, 1] int32, rows in (t, b)-major order
    # weff:    [V, HID]  (= emb @ w_ih, pre-folded in the wrapper)
    # out_ref: [B, T*V]  (lane-dense slab; wrapper reshapes to [B, T, V])
    B, TV = out_ref.shape
    V, HID = weff_ref.shape
    TB = ids_ref.shape[0]
    T = TB // B

    ctx = _encoder_ctx(patches_ref, cw_ref, cb_ref, fw_ref, fb_ref, B)

    # Input projection for ALL steps as ONE MXU matmul: one_hot(ids) @ (emb @ w_ih).
    oh = (lax.broadcasted_iota(jnp.int32, (TB, V), 1) == ids_ref[...]).astype(jnp.float32)
    X = jnp.dot(oh, weff_ref[...], preferred_element_type=jnp.float32)   # [T*B, HID]

    whh = whh_ref[...]                                              # loop-invariant hoists
    bh = bh_ref[...]

    # Serial tanh-RNN: state carried as a value (vreg-resident), statically unrolled.
    h = ctx
    h_list = []
    for t in range(T):
        h = jnp.tanh(X[t * B:(t + 1) * B, :]
                     + jnp.dot(h, whh, preferred_element_type=jnp.float32)
                     + bh)
        h_list.append(h)

    # Hoisted output projection: ONE [T*B, HID] @ [HID, V] matmul.
    H = jnp.concatenate(h_list, axis=0)                             # [T*B, HID]
    L = jnp.dot(H, wout_ref[...], preferred_element_type=jnp.float32) + bout_ref[...]

    # Lane-dense [B, T*V] output: single full-width store.
    out_ref[...] = jnp.concatenate(
        [L[t * B:(t + 1) * B, :] for t in range(T)], axis=1).astype(out_ref.dtype)


def fused_fr_kernel(patches_ref, cw_ref, cb_ref, fw_ref, fb_ref,
                    seed_ref, wcat_ref, bh_ref, wout_ref, bout_ref,
                    out_ref):
    # Free-running (argmax feedback) encoder+decoder.
    # seed_ref: VMEM [B, 1] int32 (= tgt[:, 0])
    # wcat:     [V+HID, HID]  (rows 0..V-1 = emb@w_ih, rows V.. = w_hh; pre-folded)
    # out_ref:  [B, T*V]
    B, TV = out_ref.shape
    HID, V = wout_ref.shape
    T = TV // V

    ctx = _encoder_ctx(patches_ref, cw_ref, cb_ref, fw_ref, fb_ref, B)

    wcat = wcat_ref[...]                                            # loop-invariant hoists
    bh = bh_ref[...]
    wout = wout_ref[...]
    bout = bout_ref[...]
    iota_bv = lax.broadcasted_iota(jnp.int32, (B, V), 1)

    oh = (iota_bv == seed_ref[...]).astype(jnp.float32)             # one_hot(seed)
    h = ctx
    logit_list = []
    for t in range(T):                                              # serial feedback loop
        # one fused matmul per step: oh @ (emb@w_ih) + h @ w_hh
        z = jnp.concatenate([oh, h], axis=1)                        # [B, V+HID], value-only
        h = jnp.tanh(jnp.dot(z, wcat, preferred_element_type=jnp.float32) + bh)
        logits = jnp.dot(h, wout, preferred_element_type=jnp.float32) + bout
        logit_list.append(logits)
        # argmax feedback as one-hot (first-index tie-break), on VPU/XLU
        mx = jnp.max(logits, axis=-1, keepdims=True)
        idx = jnp.min(jnp.where(logits >= mx, iota_bv, V), axis=-1, keepdims=True)
        oh = (iota_bv == idx).astype(jnp.float32)

    # Lane-dense [B, T*V] output: single full-width store.
    out_ref[...] = jnp.concatenate(logit_list, axis=1).astype(out_ref.dtype)


# ------------------------------- JAX wrapper --------------------------------

_VMEM = pl.BlockSpec(memory_space=pltpu.MemorySpace.VMEM)


def _im2col_3x3(src):
    # im2col (pure data rearrangement, kept in the wrapper): 3x3, pad=1, stride=1.
    B, C, H, W = src.shape
    srcp = jnp.pad(src, ((0, 0), (0, 0), (1, 1), (1, 1)))
    cols = [srcp[:, :, kh:kh + H, kw:kw + W] for kh in range(3) for kw in range(3)]
    patches = jnp.stack(cols, axis=2)                               # [B, C, 9, H, W]
    return patches.transpose(0, 3, 4, 1, 2).reshape(B * H * W, C * 9)


class EncoderDecoder:
    """Mirrors the PyTorch module; encoder + decoder bodies are fused in one pallas_call."""

    def __init__(self, params):
        self.p = params
        # parameter-only pre-folds (done once at construction)
        self.w_eff = jnp.dot(params["emb"], params["w_ih"])                 # [V, HID]
        self.w_cat = jnp.concatenate([self.w_eff, params["w_hh"]], axis=0)  # [V+HID, HID]
        cout, c = params["conv_w"].shape[0], params["conv_w"].shape[1]
        self.cw = params["conv_w"].reshape(cout, c * 9).T                   # [C*9, Cout]

    def forward(self, src, tgt, teacher_forcing):
        B, C, H, W = src.shape
        T = tgt.shape[1]
        V, HID = self.w_eff.shape

        patches = _im2col_3x3(src)                                   # [B*H*W, C*9]
        cout = self.cw.shape[1]
        out_shape = jax.ShapeDtypeStruct((B, T * V), jnp.float32)
        common = (patches, self.cw, self.p["conv_b"], self.p["fc_w"], self.p["fc_b"])

        flops = 2 * (patches.shape[0] * patches.shape[1] * cout      # conv matmul
                     + B * patches.shape[0] * cout                   # pooling matmul
                     + B * cout * HID                                # fc
                     + T * B * (V * HID + HID * HID + HID * V))      # decoder
        cost = pl.CostEstimate(
            flops=flops,
            transcendentals=T * B * HID,
            bytes_accessed=4 * (patches.size + self.cw.size + self.w_cat.size
                                + HID * V + B * T * V))

        if teacher_forcing:                                          # static specialization
            ids_tb = tgt.T.reshape(T * B, 1).astype(jnp.int32)       # (t, b)-major token ids
            logits_flat = pl.pallas_call(
                fused_tf_kernel,
                out_shape=out_shape,
                in_specs=[_VMEM] * 11,
                out_specs=_VMEM,
                cost_estimate=cost,
            )(*common, ids_tb, self.w_eff, self.p["w_hh"], self.p["b_h"],
              self.p["w_out"], self.p["b_out"])
        else:
            seed = tgt[:, :1].astype(jnp.int32)                      # [B, 1]
            logits_flat = pl.pallas_call(
                fused_fr_kernel,
                out_shape=out_shape,
                in_specs=[_VMEM] * 10,
                out_specs=_VMEM,
                cost_estimate=cost,
            )(*common, seed, self.w_cat, self.p["b_h"],
              self.p["w_out"], self.p["b_out"])

        # layout plumbing outside the kernel: [B, T*V] -> [B, T, V]
        return logits_flat.reshape(B, T, V)


# -------------------------------- params -----------------------------------

def init_params(key, C=4, COUT=8, HID=32, V=16, E=32):
    ks = jax.random.split(key, 9)
    s = 0.1
    return {
        "conv_w": s * jax.random.normal(ks[0], (COUT, C, 3, 3), jnp.float32),
        "conv_b": s * jax.random.normal(ks[1], (1, COUT), jnp.float32),
        "fc_w":   s * jax.random.normal(ks[2], (COUT, HID), jnp.float32),
        "fc_b":   s * jax.random.normal(ks[3], (1, HID), jnp.float32),
        "emb":    s * jax.random.normal(ks[4], (V, E), jnp.float32),
        "w_ih":   s * jax.random.normal(ks[5], (E, HID), jnp.float32),
        "w_hh":   s * jax.random.normal(ks[6], (HID, HID), jnp.float32),
        "b_h":    s * jax.random.normal(ks[7], (1, HID), jnp.float32),
        "w_out":  s * jax.random.normal(ks[8], (HID, V), jnp.float32),
        "b_out":  jnp.zeros((1, V), jnp.float32),
    }


if __name__ == "__main__":
    key = jax.random.PRNGKey(0)
    k_src, k_tgt, k_par = jax.random.split(key, 3)

    B, C, H, W = 2, 4, 16, 16
    T, V = 8, 16

    src = jax.random.normal(k_src, (B, C, H, W), jnp.float32)        # NCHW
    tgt = jax.random.randint(k_tgt, (B, T), 0, V, dtype=jnp.int32)   # token ids

    model = EncoderDecoder(init_params(k_par, C=C, V=V))

    logits_tf = model.forward(src, tgt, teacher_forcing=True)        # [B, T, V]
    logits_fr = model.forward(src, tgt, teacher_forcing=False)       # [B, T, V]
    jax.block_until_ready((logits_tf, logits_fr))

    assert logits_tf.shape == (B, T, V) and logits_fr.shape == (B, T, V)
    assert jnp.all(jnp.isfinite(logits_tf)) and jnp.all(jnp.isfinite(logits_fr))
    print("KERNEL_OK")
</pallas_src>

<mosaic_0001>
module attributes {stable_mosaic.version = 11 : i64} {
  func.func @fused_tf_kernel(%arg0: memref<512x36xf32, #tpu.memory_space<vmem>>, %arg1: memref<36x8xf32, #tpu.memory_space<vmem>>, %arg2: memref<1x8xf32, #tpu.memory_space<vmem>>, %arg3: memref<8x32xf32, #tpu.memory_space<vmem>>, %arg4: memref<1x32xf32, #tpu.memory_space<vmem>>, %arg5: memref<16x1xi32, #tpu.memory_space<vmem>>, %arg6: memref<16x32xf32, #tpu.memory_space<vmem>>, %arg7: memref<32x32xf32, #tpu.memory_space<vmem>>, %arg8: memref<1x32xf32, #tpu.memory_space<vmem>>, %arg9: memref<32x16xf32, #tpu.memory_space<vmem>>, %arg10: memref<1x16xf32, #tpu.memory_space<vmem>>, %arg11: memref<2x128xf32, #tpu.memory_space<vmem>>) attributes {dimension_semantics = [], scalar_prefetch = 0 : i64, scratch_operands = 0 : i64, tpu.core_type = #tpu.core_type<tc>} {
    %c0 = arith.constant 0 : index
    %c0_0 = arith.constant 0 : index
    %0 = vector.load %arg0[%c0, %c0_0] : memref<512x36xf32, #tpu.memory_space<vmem>>, vector<512x36xf32>
    %c0_1 = arith.constant 0 : index
    %c0_2 = arith.constant 0 : index
    %1 = vector.load %arg1[%c0_1, %c0_2] : memref<36x8xf32, #tpu.memory_space<vmem>>, vector<36x8xf32>
    %cst = arith.constant dense<0.000000e+00> : vector<512x8xf32>
    %2 = tpu.matmul %0, %1, %cst {dimension_numbers = #tpu.dot_dimension_numbers<[1], [0], [0], [1], [0, 0, 1, 1], [], []>} : vector<512x36xf32>, vector<36x8xf32>, vector<512x8xf32> -> vector<512x8xf32>
    %c0_3 = arith.constant 0 : index
    %c0_4 = arith.constant 0 : index
    %3 = vector.load %arg2[%c0_3, %c0_4] : memref<1x8xf32, #tpu.memory_space<vmem>>, vector<1x8xf32>
    %4 = vector.broadcast %3 : vector<1x8xf32> to vector<512x8xf32>
    %5 = arith.addf %2, %4 : vector<512x8xf32>
    %cst_5 = arith.constant 0.000000e+00 : f32
    %6 = vector.broadcast %cst_5 : f32 to vector<512x8xf32>
    %7 = arith.maximumf %5, %6 : vector<512x8xf32>
    %8 = tpu.iota {dimensions = array<i32: 0>} : vector<2x512xi32>
    %9 = tpu.iota {dimensions = array<i32: 1>} : vector<2x512xi32>
    %c256_i32 = arith.constant 256 : i32
    %10 = vector.broadcast %c256_i32 : i32 to vector<2x512xi32>
    %11 = arith.muli %8, %10 : vector<2x512xi32>
    %12 = arith.cmpi sge, %9, %11 : vector<2x512xi32>
    %c1_i32 = arith.constant 1 : i32
    %13 = vector.broadcast %c1_i32 : i32 to vector<2x512xi32>
    %14 = arith.addi %8, %13 : vector<2x512xi32>
    %c256_i32_6 = arith.constant 256 : i32
    %15 = vector.broadcast %c256_i32_6 : i32 to vector<2x512xi32>
    %16 = arith.muli %14, %15 : vector<2x512xi32>
    %17 = arith.cmpi slt, %9, %16 : vector<2x512xi32>
    %18 = arith.andi %12, %17 : vector<2x512xi1>
    %cst_7 = arith.constant 3.906250e-03 : f32
    %cst_8 = arith.constant 0.000000e+00 : f32
    %19 = vector.broadcast %cst_7 : f32 to vector<2x512xf32>
    %20 = vector.broadcast %cst_8 : f32 to vector<2x512xf32>
    %21 = arith.select %18, %19, %20 : vector<2x512xi1>, vector<2x512xf32>
    %cst_9 = arith.constant dense<0.000000e+00> : vector<2x8xf32>
    %22 = tpu.matmul %21, %7, %cst_9 {dimension_numbers = #tpu.dot_dimension_numbers<[1], [0], [0], [1], [0, 0, 1, 1], [], []>} : vector<2x512xf32>, vector<512x8xf32>, vector<2x8xf32> -> vector<2x8xf32>
    %c0_10 = arith.constant 0 : index
    %c0_11 = arith.constant 0 : index
    %23 = vector.load %arg3[%c0_10, %c0_11] : memref<8x32xf32, #tpu.memory_space<vmem>>, vector<8x32xf32>
    %cst_12 = arith.constant dense<0.000000e+00> : vector<2x32xf32>
    %24 = tpu.matmul %22, %23, %cst_12 {dimension_numbers = #tpu.dot_dimension_numbers<[1], [0], [0], [1], [0, 0, 1, 1], [], []>} : vector<2x8xf32>, vector<8x32xf32>, vector<2x32xf32> -> vector<2x32xf32>
    %c0_13 = arith.constant 0 : index
    %c0_14 = arith.constant 0 : index
    %25 = vector.load %arg4[%c0_13, %c0_14] : memref<1x32xf32, #tpu.memory_space<vmem>>, vector<1x32xf32>
    %26 = vector.broadcast %25 : vector<1x32xf32> to vector<2x32xf32>
    %27 = arith.addf %24, %26 : vector<2x32xf32>
    %28 = tpu.iota {dimensions = array<i32: 1>} : vector<16x16xi32>
    %c0_15 = arith.constant 0 : index
    %c0_16 = arith.constant 0 : index
    %29 = vector.load %arg5[%c0_15, %c0_16] : memref<16x1xi32, #tpu.memory_space<vmem>>, vector<16x1xi32>
    %30 = vector.broadcast %29 : vector<16x1xi32> to vector<16x16xi32>
    %31 = arith.cmpi eq, %28, %30 : vector<16x16xi32>
    %32 = arith.extui %31 : vector<16x16xi1> to vector<16x16xi32>
    %33 = arith.sitofp %32 : vector<16x16xi32> to vector<16x16xf32>
    %c0_17 = arith.constant 0 : index
    %c0_18 = arith.constant 0 : index
    %34 = vector.load %arg6[%c0_17, %c0_18] : memref<16x32xf32, #tpu.memory_space<vmem>>, vector<16x32xf32>
    %cst_19 = arith.constant dense<0.000000e+00> : vector<16x32xf32>
    %35 = tpu.matmul %33, %34, %cst_19 {dimension_numbers = #tpu.dot_dimension_numbers<[1], [0], [0], [1], [0, 0, 1, 1], [], []>} : vector<16x16xf32>, vector<16x32xf32>, vector<16x32xf32> -> vector<16x32xf32>
    %c0_20 = arith.constant 0 : index
    %c0_21 = arith.constant 0 : index
    %36 = vector.load %arg7[%c0_20, %c0_21] : memref<32x32xf32, #tpu.memory_space<vmem>>, vector<32x32xf32>
    %c0_22 = arith.constant 0 : index
    %c0_23 = arith.constant 0 : index
    %37 = vector.load %arg8[%c0_22, %c0_23] : memref<1x32xf32, #tpu.memory_space<vmem>>, vector<1x32xf32>
    %38 = vector.extract_strided_slice %35 {offsets = [0, 0], sizes = [2, 32], strides = [1, 1]} : vector<16x32xf32> to vector<2x32xf32>
    %cst_24 = arith.constant dense<0.000000e+00> : vector<2x32xf32>
    %39 = tpu.matmul %27, %36, %cst_24 {dimension_numbers = #tpu.dot_dimension_numbers<[1], [0], [0], [1], [0, 0, 1, 1], [], []>} : vector<2x32xf32>, vector<32x32xf32>, vector<2x32xf32> -> vector<2x32xf32>
    %40 = arith.addf %38, %39 : vector<2x32xf32>
    %41 = vector.broadcast %37 : vector<1x32xf32> to vector<2x32xf32>
    %42 = arith.addf %40, %41 : vector<2x32xf32>
    %43 = math.tanh %42 : vector<2x32xf32>
    %44 = vector.extract_strided_slice %35 {offsets = [2, 0], sizes = [2, 32], strides = [1, 1]} : vector<16x32xf32> to vector<2x32xf32>
    %cst_25 = arith.constant dense<0.000000e+00> : vector<2x32xf32>
    %45 = tpu.matmul %43, %36, %cst_25 {dimension_numbers = #tpu.dot_dimension_numbers<[1], [0], [0], [1], [0, 0, 1, 1], [], []>} : vector<2x32xf32>, vector<32x32xf32>, vector<2x32xf32> -> vector<2x32xf32>
    %46 = arith.addf %44, %45 : vector<2x32xf32>
    %47 = vector.broadcast %37 : vector<1x32xf32> to vector<2x32xf32>
    %48 = arith.addf %46, %47 : vector<2x32xf32>
    %49 = math.tanh %48 : vector<2x32xf32>
    %50 = vector.extract_strided_slice %35 {offsets = [4, 0], sizes = [2, 32], strides = [1, 1]} : vector<16x32xf32> to vector<2x32xf32>
    %cst_26 = arith.constant dense<0.000000e+00> : vector<2x32xf32>
    %51 = tpu.matmul %49, %36, %cst_26 {dimension_numbers = #tpu.dot_dimension_numbers<[1], [0], [0], [1], [0, 0, 1, 1], [], []>} : vector<2x32xf32>, vector<32x32xf32>, vector<2x32xf32> -> vector<2x32xf32>
    %52 = arith.addf %50, %51 : vector<2x32xf32>
    %53 = vector.broadcast %37 : vector<1x32xf32> to vector<2x32xf32>
    %54 = arith.addf %52, %53 : vector<2x32xf32>
    %55 = math.tanh %54 : vector<2x32xf32>
    %56 = vector.extract_strided_slice %35 {offsets = [6, 0], sizes = [2, 32], strides = [1, 1]} : vector<16x32xf32> to vector<2x32xf32>
    %cst_27 = arith.constant dense<0.000000e+00> : vector<2x32xf32>
    %57 = tpu.matmul %55, %36, %cst_27 {dimension_numbers = #tpu.dot_dimension_numbers<[1], [0], [0], [1], [0, 0, 1, 1], [], []>} : vector<2x32xf32>, vector<32x32xf32>, vector<2x32xf32> -> vector<2x32xf32>
    %58 = arith.addf %56, %57 : vector<2x32xf32>
    %59 = vector.broadcast %37 : vector<1x32xf32> to vector<2x32xf32>
    %60 = arith.addf %58, %59 : vector<2x32xf32>
    %61 = math.tanh %60 : vector<2x32xf32>
    %62 = vector.extract_strided_slice %35 {offsets = [8, 0], sizes = [2, 32], strides = [1, 1]} : vector<16x32xf32> to vector<2x32xf32>
    %cst_28 = arith.constant dense<0.000000e+00> : vector<2x32xf32>
    %63 = tpu.matmul %61, %36, %cst_28 {dimension_numbers = #tpu.dot_dimension_numbers<[1], [0], [0], [1], [0, 0, 1, 1], [], []>} : vector<2x32xf32>, vector<32x32xf32>, vector<2x32xf32> -> vector<2x32xf32>
    %64 = arith.addf %62, %63 : vector<2x32xf32>
    %65 = vector.broadcast %37 : vector<1x32xf32> to vector<2x32xf32>
    %66 = arith.addf %64, %65 : vector<2x32xf32>
    %67 = math.tanh %66 : vector<2x32xf32>
    %68 = vector.extract_strided_slice %35 {offsets = [10, 0], sizes = [2, 32], strides = [1, 1]} : vector<16x32xf32> to vector<2x32xf32>
    %cst_29 = arith.constant dense<0.000000e+00> : vector<2x32xf32>
    %69 = tpu.matmul %67, %36, %cst_29 {dimension_numbers = #tpu.dot_dimension_numbers<[1], [0], [0], [1], [0, 0, 1, 1], [], []>} : vector<2x32xf32>, vector<32x32xf32>, vector<2x32xf32> -> vector<2x32xf32>
    %70 = arith.addf %68, %69 : vector<2x32xf32>
    %71 = vector.broadcast %37 : vector<1x32xf32> to vector<2x32xf32>
    %72 = arith.addf %70, %71 : vector<2x32xf32>
    %73 = math.tanh %72 : vector<2x32xf32>
    %74 = vector.extract_strided_slice %35 {offsets = [12, 0], sizes = [2, 32], strides = [1, 1]} : vector<16x32xf32> to vector<2x32xf32>
    %cst_30 = arith.constant dense<0.000000e+00> : vector<2x32xf32>
    %75 = tpu.matmul %73, %36, %cst_30 {dimension_numbers = #tpu.dot_dimension_numbers<[1], [0], [0], [1], [0, 0, 1, 1], [], []>} : vector<2x32xf32>, vector<32x32xf32>, vector<2x32xf32> -> vector<2x32xf32>
    %76 = arith.addf %74, %75 : vector<2x32xf32>
    %77 = vector.broadcast %37 : vector<1x32xf32> to vector<2x32xf32>
    %78 = arith.addf %76, %77 : vector<2x32xf32>
    %79 = math.tanh %78 : vector<2x32xf32>
    %80 = vector.extract_strided_slice %35 {offsets = [14, 0], sizes = [2, 32], strides = [1, 1]} : vector<16x32xf32> to vector<2x32xf32>
    %cst_31 = arith.constant dense<0.000000e+00> : vector<2x32xf32>
    %81 = tpu.matmul %79, %36, %cst_31 {dimension_numbers = #tpu.dot_dimension_numbers<[1], [0], [0], [1], [0, 0, 1, 1], [], []>} : vector<2x32xf32>, vector<32x32xf32>, vector<2x32xf32> -> vector<2x32xf32>
    %82 = arith.addf %80, %81 : vector<2x32xf32>
    %83 = vector.broadcast %37 : vector<1x32xf32> to vector<2x32xf32>
    %84 = arith.addf %82, %83 : vector<2x32xf32>
    %85 = math.tanh %84 : vector<2x32xf32>
    %86 = tpu.concatenate %43, %49, %55, %61, %67, %73, %79, %85 in 0 : vector<2x32xf32>, vector<2x32xf32>, vector<2x32xf32>, vector<2x32xf32>, vector<2x32xf32>, vector<2x32xf32>, vector<2x32xf32>, vector<2x32xf32> -> vector<16x32xf32>
    %c0_32 = arith.constant 0 : index
    %c0_33 = arith.constant 0 : index
    %87 = vector.load %arg9[%c0_32, %c0_33] : memref<32x16xf32, #tpu.memory_space<vmem>>, vector<32x16xf32>
    %cst_34 = arith.constant dense<0.000000e+00> : vector<16x16xf32>
    %88 = tpu.matmul %86, %87, %cst_34 {dimension_numbers = #tpu.dot_dimension_numbers<[1], [0], [0], [1], [0, 0, 1, 1], [], []>} : vector<16x32xf32>, vector<32x16xf32>, vector<16x16xf32> -> vector<16x16xf32>
    %c0_35 = arith.constant 0 : index
    %c0_36 = arith.constant 0 : index
    %89 = vector.load %arg10[%c0_35, %c0_36] : memref<1x16xf32, #tpu.memory_space<vmem>>, vector<1x16xf32>
    %90 = vector.broadcast %89 : vector<1x16xf32> to vector<16x16xf32>
    %91 = arith.addf %88, %90 : vector<16x16xf32>
    %92 = vector.extract_strided_slice %91 {offsets = [0, 0], sizes = [2, 16], strides = [1, 1]} : vector<16x16xf32> to vector<2x16xf32>
    %93 = vector.extract_strided_slice %91 {offsets = [2, 0], sizes = [2, 16], strides = [1, 1]} : vector<16x16xf32> to vector<2x16xf32>
    %94 = vector.extract_strided_slice %91 {offsets = [4, 0], sizes = [2, 16], strides = [1, 1]} : vector<16x16xf32> to vector<2x16xf32>
    %95 = vector.extract_strided_slice %91 {offsets = [6, 0], sizes = [2, 16], strides = [1, 1]} : vector<16x16xf32> to vector<2x16xf32>
    %96 = vector.extract_strided_slice %91 {offsets = [8, 0], sizes = [2, 16], strides = [1, 1]} : vector<16x16xf32> to vector<2x16xf32>
    %97 = vector.extract_strided_slice %91 {offsets = [10, 0], sizes = [2, 16], strides = [1, 1]} : vector<16x16xf32> to vector<2x16xf32>
    %98 = vector.extract_strided_slice %91 {offsets = [12, 0], sizes = [2, 16], strides = [1, 1]} : vector<16x16xf32> to vector<2x16xf32>
    %99 = vector.extract_strided_slice %91 {offsets = [14, 0], sizes = [2, 16], strides = [1, 1]} : vector<16x16xf32> to vector<2x16xf32>
    %100 = tpu.concatenate %92, %93, %94, %95, %96, %97, %98, %99 in 1 : vector<2x16xf32>, vector<2x16xf32>, vector<2x16xf32>, vector<2x16xf32>, vector<2x16xf32>, vector<2x16xf32>, vector<2x16xf32>, vector<2x16xf32> -> vector<2x128xf32>
    %c0_37 = arith.constant 0 : index
    %c0_38 = arith.constant 0 : index
    %101 = vector.load %arg11[%c0_37, %c0_38] : memref<2x128xf32, #tpu.memory_space<vmem>>, vector<2x128xf32>
    tpu.vector_store %arg11[%c0_37, %c0_38], %100 {strides = array<i32>} : memref<2x128xf32, #tpu.memory_space<vmem>>, vector<2x128xf32>,
    return
  }
}

</mosaic_0001>

<bundles_post_ra>
// kernel: tpu_custom_call.1
= control target key start
LH: loop header
LB: loop body
LE: loop exit
PB: predicated region body
PF: predicated region fallthrough
CT: control target
= control target key end

     0   :  { %vm115_vm0 = vcmask 293888   ;;  %vm308_vm1 = vcmask 1043456   ;;  %s3235_s0 = inlined_call_operand.vmem [shape: f32[512,36], index: 0, kind: input, shape index: {}]   ;;  %s3236_s1 = inlined_call_operand.vmem [shape: f32[36,8], index: 1, kind: input, shape index: {}]   ;;  %s3237_s2 = inlined_call_operand.vmem [shape: f32[1,8], index: 2, kind: input, shape index: {}]   ;;  %s3238_s3 = inlined_call_operand.vmem [shape: f32[8,32], index: 3, kind: input, shape index: {}]   ;;  %s3239_s4 = inlined_call_operand.vmem [shape: f32[1,32], index: 4, kind: input, shape index: {}]   ;;  %s3240_s5 = inlined_call_operand.vmem [shape: s32[16,1], index: 5, kind: input, shape index: {}]   ;;  %s3241_s6 = inlined_call_operand.vmem [shape: f32[16,32], index: 6, kind: input, shape index: {}]   ;;  %s3242_s7 = inlined_call_operand.vmem [shape: f32[32,32], index: 7, kind: input, shape index: {}]   ;;  %s3243_s8 = inlined_call_operand.vmem [shape: f32[1,32], index: 8, kind: input, shape index: {}]   ;;  %s3244_s9 = inlined_call_operand.vmem [shape: f32[32,16], index: 9, kind: input, shape index: {}]   ;;  %s3245_s10 = inlined_call_operand.vmem [shape: f32[1,16], index: 10, kind: input, shape index: {}]   ;;  %s3246_s11 = inlined_call_operand.hbm [shape: f32[2,128], index: 11, kind: output, shape index: {}]  }
   0x1   :  { %v103_v0 = vld [vmem:[%s3236_s1] sm:$0xff]  ;;  %v104_v1 = vld [vmem:[%s3236_s1 + $0x8] sm:$0xff]  ;;  %v105_v2 = vld [vmem:[%s3236_s1 + $0x10] sm:$0xff] }
   0x2   :  { %v2402_v3 = vpack.c.bf16 %v104_v1, %v103_v0  ;;  %v106_v4 = vld [vmem:[%s3236_s1 + $0x18] sm:$0xff]  ;;  %v39_v5 = vld [vmem:[%s3235_s0] sm:$0xff]  ;;  %v40_v8 = vld [vmem:[%s3235_s0 + $0x8] sm:$0xff] }
   0x3   :  { %v2406_v6 = vpack.c.bf16 %v106_v4, %v105_v2  ;;  %2195 = vmatprep.mubr.msk.f32.mxu0 %vm115_vm0, %v39_v5  ;;  %v107_v7 = vld [vmem:[%s3236_s1 + $0x20] sm:$0xf]  ;;  %v41_v9 = vld [vmem:[%s3235_s0 + $0x10] sm:$0xff]  ;;  %v42_v10 = vld [vmem:[%s3235_s0 + $0x18] sm:$0xff] }
   0x4   :  { %2403 = vmatprep.subr.bf16.mxu0 %v2402_v3  ;;  %v43_v11 = vld [vmem:[%s3235_s0 + $0x20] sm:$0xff]  ;;  %v44_v12 = vld [vmem:[%s3235_s0 + $0x28] sm:$0xff]  ;;  %v45_v13 = vld [vmem:[%s3235_s0 + $0x30] sm:$0xff] }
   0x5   :  { %2405 = vmatpush3.bf16.msra.mxu0 %v2402_v3  ;;  %v46_v14 = vld [vmem:[%s3235_s0 + $0x38] sm:$0xff]  ;;  %v47_v15 = vld [vmem:[%s3235_s0 + $0x40] sm:$0xff] }
   0x6   :  { %2407 = vmatprep.subr.bf16.mxu0 %v2406_v6 }
   0x9   :  { %2409 = vmatpush3.bf16.msra.mxu0 %v2406_v6 }
   0xa   :  { %2193 = vmatprep.subr.msk.mxu0 %vm308_vm1, %v107_v7 }
   0xd   :  { %2194 = vmatpush3.msk.msra.mxu0 %vm308_vm1, %v107_v7 }
   0xe   :  { %2196 = vmatmul.mubr.msk.f32.vlgmr.msra.gmra.mrb[0].mxu0 %vm115_vm0, %v40_v8 }
   0xf   :  { %2198 = vmatprep.mubr.msk.f32.mxu0 %vm115_vm0, %v41_v9 }
  0x12   :  { %2199 = vmatmul.mubr.msk.f32.gmra.mrb[2].mxu0 %vm115_vm0, %v42_v10 }
  0x13   :  { %2201 = vmatprep.mubr.msk.f32.mxu0 %vm115_vm0, %v43_v11 }
  0x16   :  { %2202 = vmatmul.mubr.msk.f32.gmra.mrb[4].mxu0 %vm115_vm0, %v44_v12 }
  0x17   :  { %2204 = vmatprep.mubr.msk.f32.mxu0 %vm115_vm0, %v45_v13 }
  0x18   :  { %16 = vsyncpa [#allocation3], 0  ;;  %v48_v16 = vld [vmem:[%s3235_s0 + $0x48] sm:$0xff]  ;;  %v49_v17 = vld [vmem:[%s3235_s0 + $0x50] sm:$0xff]  ;;  %v761_v7 = vlaneseq  ;;  %vm2590_vm14 = vmmov 0   ;;  %vm935_vm15 = vcmask 64512  }
  0x19   :  { %v50_v18 = vld [vmem:[%s3235_s0 + $0x58] sm:$0xff]  ;;  %v51_v19 = vld [vmem:[%s3235_s0 + $0x60] sm:$0xff]  ;;  %v52_v20 = vld [vmem:[%s3235_s0 + $0x68] sm:$0xff]  ;;  %s2593_s18 = smov 64   ;;  %s2594_s19 = smov 80  }
  0x1a   :  { %2205 = vmatmul.mubr.msk.f32.gmra.mrb[6].mxu0 %vm115_vm0, %v46_v14  ;;  %v53_v21 = vld [vmem:[%s3235_s0 + $0x70] sm:$0xff]  ;;  %v54_v22 = vld [vmem:[%s3235_s0 + $0x78] sm:$0xff]  ;;  %v55_v23 = vld [vmem:[%s3235_s0 + $0x80] sm:$0xff]  ;;  %v762_v8 = vshrl.u32 %v761_v7, 7  ;;  %v2934_v9 = vand.u32 127, %v761_v7  ;;  %v2588_v14 = vmov 0.00390625  }
  0x1b   :  { %2207 = vmatprep.mubr.msk.f32.mxu0 %vm115_vm0, %v47_v15  ;;  %v56_v24 = vld [vmem:[%s3235_s0 + $0x88] sm:$0xff]  ;;  %v57_v25 = vld [vmem:[%s3235_s0 + $0x90] sm:$0xff]  ;;  %v58_v26 = vld [vmem:[%s3235_s0 + $0x98] sm:$0xff]  ;;  %s2595_s20 = smov 16   ;;  %s2596_s21 = smov 48  }
  0x1c   :  { %v59_v27 = vld [vmem:[%s3235_s0 + $0xa0] sm:$0xff]  ;;  %v60_v28 = vld [vmem:[%s3235_s0 + $0xa8] sm:$0xff]  ;;  %v61_v29 = vld [vmem:[%s3235_s0 + $0xb0] sm:$0xff]  ;;  %v773_v10 = vadd.s32 1, %v762_v8  ;;  %v765_v11 = vadd.s32 128, %v2934_v9  ;;  %v768_v12 = vmul.u32 256, %v762_v8 }
  0x1d   :  { %v62_v30 = vld [vmem:[%s3235_s0 + $0xb8] sm:$0xff]  ;;  %v63_v31 = vld [vmem:[%s3235_s0 + $0xc0] sm:$0xff]  ;;  %v64_v32 = vld [vmem:[%s3235_s0 + $0xc8] sm:$0xff]  ;;  %s2597_s22 = smov 32   ;;  %s2600_s23 = smov [#allocation2]  }
  0x1e   :  { %2208 = vmatmul.mubr.msk.f32.gmra.mrb[8].mxu0 %vm115_vm0, %v48_v16  ;;  %v65_v33 = vld [vmem:[%s3235_s0 + $0xd0] sm:$0xff]  ;;  %v66_v34 = vld [vmem:[%s3235_s0 + $0xd8] sm:$0xff]  ;;  %v67_v35 = vld [vmem:[%s3235_s0 + $0xe0] sm:$0xff]  ;;  %v774_v13 = vmul.u32 256, %v773_v10  ;;  %vm770_vm2 = vcmp.ge.s32.totalorder %v765_v11, %v768_v12  ;;  %vm769_vm5 = vcmp.ge.s32.totalorder %v2934_v9, %v768_v12 }
  0x1f   :  { %2210 = vmatprep.mubr.msk.f32.mxu0 %vm115_vm0, %v49_v17  ;;  %v68_v36 = vld [vmem:[%s3235_s0 + $0xe8] sm:$0xff]  ;;  %v69_v37 = vld [vmem:[%s3235_s0 + $0xf0] sm:$0xff]  ;;  %v70_v38 = vld [vmem:[%s3235_s0 + $0xf8] sm:$0xff] }
  0x20   :  { %v71_v39 = vld [vmem:[%s3235_s0 + $0x100] sm:$0xff]  ;;  %v72_v40 = vld [vmem:[%s3235_s0 + $0x108] sm:$0xff]  ;;  %v73_v41 = vld [vmem:[%s3235_s0 + $0x110] sm:$0xff]  ;;  %vm776_vm3 = vcmp.lt.s32.totalorder %v765_v11, %v774_v13  ;;  %vm775_vm6 = vcmp.lt.s32.totalorder %v2934_v9, %v774_v13 }
  0x21   :  { %v74_v42 = vld [vmem:[%s3235_s0 + $0x118] sm:$0xff]  ;;  %v75_v43 = vld [vmem:[%s3235_s0 + $0x120] sm:$0xff]  ;;  %v76_v44 = vld [vmem:[%s3235_s0 + $0x128] sm:$0xff] }
  0x22   :  { %2211 = vmatmul.mubr.msk.f32.gmra.mrb[10].mxu0 %vm115_vm0, %v50_v18  ;;  %v77_v45 = vld [vmem:[%s3235_s0 + $0x130] sm:$0xff]  ;;  %v78_v46 = vld [vmem:[%s3235_s0 + $0x138] sm:$0xff]  ;;  %v79_v47 = vld [vmem:[%s3235_s0 + $0x140] sm:$0xff] }
  0x23   :  { %2213 = vmatprep.mubr.msk.f32.mxu0 %vm115_vm0, %v51_v19  ;;  %v80_v48 = vld [vmem:[%s3235_s0 + $0x148] sm:$0xff]  ;;  %v81_v49 = vld [vmem:[%s3235_s0 + $0x150] sm:$0xff]  ;;  %v82_v50 = vld [vmem:[%s3235_s0 + $0x158] sm:$0xff] }
  0x24   :  { %v83_v51 = vld [vmem:[%s3235_s0 + $0x160] sm:$0xff]  ;;  %v84_v52 = vld [vmem:[%s3235_s0 + $0x168] sm:$0xff]  ;;  %v85_v53 = vld [vmem:[%s3235_s0 + $0x170] sm:$0xff] }
  0x25   :  { %v86_v54 = vld [vmem:[%s3235_s0 + $0x178] sm:$0xff]  ;;  %v87_v55 = vld [vmem:[%s3235_s0 + $0x180] sm:$0xff]  ;;  %v88_v56 = vld [vmem:[%s3235_s0 + $0x188] sm:$0xff] }
  0x26   :  { %2214 = vmatmul.mubr.msk.f32.gmra.mrb[12].mxu0 %vm115_vm0, %v52_v20  ;;  %v89_v57 = vld [vmem:[%s3235_s0 + $0x190] sm:$0xff]  ;;  %v90_v58 = vld [vmem:[%s3235_s0 + $0x198] sm:$0xff]  ;;  %v91_v59 = vld [vmem:[%s3235_s0 + $0x1a0] sm:$0xff] }
  0x27   :  { %2216 = vmatprep.mubr.msk.f32.mxu0 %vm115_vm0, %v53_v21  ;;  %v92_v60 = vld [vmem:[%s3235_s0 + $0x1a8] sm:$0xff]  ;;  %v93_v61 = vld [vmem:[%s3235_s0 + $0x1b0] sm:$0xff]  ;;  %v94_v62 = vld [vmem:[%s3235_s0 + $0x1b8] sm:$0xff] }
  0x28   :  { %v95_v63 = vld [vmem:[%s3235_s0 + $0x1c0] sm:$0xff]  ;;  %v96_v0 = vld [vmem:[%s3235_s0 + $0x1c8] sm:$0xff]  ;;  %v97_v1 = vld [vmem:[%s3235_s0 + $0x1d0] sm:$0xff] }
  0x29   :  { %v98_v2 = vld [vmem:[%s3235_s0 + $0x1d8] sm:$0xff]  ;;  %v99_v3 = vld [vmem:[%s3235_s0 + $0x1e0] sm:$0xff]  ;;  %v100_v4 = vld [vmem:[%s3235_s0 + $0x1e8] sm:$0xff] }
  0x2a   :  { %2217 = vmatmul.mubr.msk.f32.gmra.mrb[14].mxu0 %vm115_vm0, %v54_v22  ;;  %v101_v5 = vld [vmem:[%s3235_s0 + $0x1f0] sm:$0xff]  ;;  %v102_v6 = vld [vmem:[%s3235_s0 + $0x1f8] sm:$0xff]  ;;  %vm780_vm4 = vmand %vm770_vm2, %vm776_vm3  ;;  %v767_v22 = vadd.s32 384, %v2934_v9 }
  0x2b   :  { %2219 = vmatprep.mubr.msk.f32.mxu0 %vm115_vm0, %v55_v23  ;;  %1972 = vmatprep.mubr.msk.f32.mxu1 %vm780_vm4, %v2588_v14  ;;  %vm2940_vm7 = vmand %vm769_vm5, %vm775_vm6  ;;  %v2947_v16 = vld [vmem:[%s3237_s2] ss:$0 sm:$0xff]  ;;  %vm1112_vm4 = vcmask 261120   ;;  %vm1750_vm5 = vcmask 1041408   ;;  %vm1753_vm6 = vcmask 1045504  }
  0x2c   :  { %vm772_vm8 = vcmp.ge.s32.totalorder %v767_v22, %v768_v12  ;;  %vm778_vm9 = vcmp.lt.s32.totalorder %v767_v22, %v774_v13 }
  0x2d   :  { %vm2957_vm10 = vmand %vm772_vm8, %vm778_vm9  ;;  %vm1885_vm8 = vcmask 654336   ;;  %vm1887_vm9 = vcmask 785408  }
  0x2e   :  { %2220 = vmatmul.mubr.msk.f32.gmra.mrb[16].mxu0 %vm115_vm0, %v56_v24 }
  0x2f   :  { %2222 = vmatprep.mubr.msk.f32.mxu0 %vm115_vm0, %v57_v25  ;;  %v766_v25 = vadd.s32 256, %v2934_v9 }
  0x31   :  { %vm771_vm11 = vcmp.ge.s32.totalorder %v766_v25, %v768_v12  ;;  %vm777_vm12 = vcmp.lt.s32.totalorder %v766_v25, %v774_v13 }
  0x32   :  { %2223 = vmatmul.mubr.msk.f32.gmra.mrb[18].mxu0 %vm115_vm0, %v58_v26  ;;  %vm2961_vm13 = vmand %vm771_vm11, %vm777_vm12 }
  0x33   :  { %2225 = vmatprep.mubr.msk.f32.mxu0 %vm115_vm0, %v59_v27 }
  0x36   :  { %2226 = vmatmul.mubr.msk.f32.gmra.mrb[20].mxu0 %vm115_vm0, %v60_v28 }
  0x37   :  { %2228 = vmatprep.mubr.msk.f32.mxu0 %vm115_vm0, %v61_v29 }
  0x3a   :  { %2229 = vmatmul.mubr.msk.f32.gmra.mrb[22].mxu0 %vm115_vm0, %v62_v30 }
  0x3b   :  { %2231 = vmatprep.mubr.msk.f32.mxu0 %vm115_vm0, %v63_v31 }
  0x3e   :  { %2232 = vmatmul.mubr.msk.f32.gmra.mrb[24].mxu0 %vm115_vm0, %v64_v32  ;;  %v1023_v32 = vld [vmem:[%s3241_s6] sm:$0xff] }
  0x3f   :  { %2234 = vmatprep.mubr.msk.f32.mxu0 %vm115_vm0, %v65_v33 }
  0x42   :  { %2235 = vmatmul.mubr.msk.f32.gmra.mrb[26].mxu0 %vm115_vm0, %v66_v34 }
  0x43   :  { %2237 = vmatprep.mubr.msk.f32.mxu0 %vm115_vm0, %v67_v35 }
  0x46   :  { %2238 = vmatmul.mubr.msk.f32.gmra.mrb[28].mxu0 %vm115_vm0, %v68_v36 }
  0x47   :  { %2240 = vmatprep.mubr.msk.f32.mxu0 %vm115_vm0, %v69_v37 }
  0x4a   :  { %2241 = vmatmul.mubr.msk.f32.gmra.mrb[30].mxu0 %vm115_vm0, %v70_v38 }
  0x4b   :  { %2243 = vmatprep.mubr.msk.f32.mxu0 %vm115_vm0, %v71_v39 }
  0x4e   :  { %2244 = vmatmul.mubr.msk.f32.gmra.mrb[32].mxu0 %vm115_vm0, %v72_v40 }
  0x4f   :  { %2246 = vmatprep.mubr.msk.f32.mxu0 %vm115_vm0, %v73_v41 }
  0x52   :  { %2247 = vmatmul.mubr.msk.f32.gmra.mrb[34].mxu0 %vm115_vm0, %v74_v42 }
  0x53   :  { %2249 = vmatprep.mubr.msk.f32.mxu0 %vm115_vm0, %v75_v43 }
  0x56   :  { %2250 = vmatmul.mubr.msk.f32.gmra.mrb[36].mxu0 %vm115_vm0, %v76_v44 }
  0x57   :  { %2252 = vmatprep.mubr.msk.f32.mxu0 %vm115_vm0, %v77_v45 }
  0x5a   :  { %2253 = vmatmul.mubr.msk.f32.gmra.mrb[38].mxu0 %vm115_vm0, %v78_v46 }
  0x5b   :  { %2255 = vmatprep.mubr.msk.f32.mxu0 %vm115_vm0, %v79_v47 }
  0x5e   :  { %2256 = vmatmul.mubr.msk.f32.gmra.mrb[40].mxu0 %vm115_vm0, %v80_v48 }
  0x5f   :  { %2258 = vmatprep.mubr.msk.f32.mxu0 %vm115_vm0, %v81_v49 }
  0x62   :  { %2259 = vmatmul.mubr.msk.f32.gmra.mrb[42].mxu0 %vm115_vm0, %v82_v50 }
  0x63   :  { %2261 = vmatprep.mubr.msk.f32.mxu0 %vm115_vm0, %v83_v51 }
  0x66   :  { %2262 = vmatmul.mubr.msk.f32.gmra.mrb[44].mxu0 %vm115_vm0, %v84_v52 }
  0x67   :  { %2264 = vmatprep.mubr.msk.f32.mxu0 %vm115_vm0, %v85_v53 }
  0x6a   :  { %2265 = vmatmul.mubr.msk.f32.gmra.mrb[46].mxu0 %vm115_vm0, %v86_v54 }
  0x6b   :  { %2267 = vmatprep.mubr.msk.f32.mxu0 %vm115_vm0, %v87_v55 }
  0x6e   :  { %2268 = vmatmul.mubr.msk.f32.gmra.mrb[48].mxu0 %vm115_vm0, %v88_v56 }
  0x6f   :  { %2270 = vmatprep.mubr.msk.f32.mxu0 %vm115_vm0, %v89_v57 }
  0x72   :  { %2271 = vmatmul.mubr.msk.f32.gmra.mrb[50].mxu0 %vm115_vm0, %v90_v58 }
  0x73   :  { %2273 = vmatprep.mubr.msk.f32.mxu0 %vm115_vm0, %v91_v59 }
  0x76   :  { %2274 = vmatmul.mubr.msk.f32.gmra.mrb[52].mxu0 %vm115_vm0, %v92_v60 }
  0x77   :  { %2276 = vmatprep.mubr.msk.f32.mxu0 %vm115_vm0, %v93_v61 }
  0x7a   :  { %2277 = vmatmul.mubr.msk.f32.gmra.mrb[54].mxu0 %vm115_vm0, %v94_v62 }
  0x7b   :  { %2279 = vmatprep.mubr.msk.f32.mxu0 %vm115_vm0, %v95_v63 }
  0x7e   :  { %2280 = vmatmul.mubr.msk.f32.gmra.mrb[56].mxu0 %vm115_vm0, %v96_v0 }
  0x7f   :  { %2282 = vmatprep.mubr.msk.f32.mxu0 %vm115_vm0, %v97_v1 }
  0x82   :  { %2283 = vmatmul.mubr.msk.f32.gmra.mrb[58].mxu0 %vm115_vm0, %v98_v2 }
  0x83   :  { %2285 = vmatprep.mubr.msk.f32.mxu0 %vm115_vm0, %v99_v3 }
  0x86   :  { %2286 = vmatmul.mubr.msk.f32.gmra.mrb[60].mxu0 %vm115_vm0, %v100_v4 }
  0x87   :  { %2288 = vmatprep.mubr.msk.f32.mxu0 %vm115_vm0, %v101_v5 }
  0x8a   :  { %2289 = vmatmul.mubr.msk.f32.gmra.mrb[62].mxu0 %vm115_vm0, %v102_v6  ;;  %vm1025_vm0 = vcmask 130048  }
  0xe1   :  { %v2197_v17 = vpop.f32.mrb[0].mxu0 }
  0xe2   :  { %v384_v18 = vadd.f32 %v2197_v17, %v2947_v16  ;;  %v378_v19 = vpop.f32.mrb[1].mxu0 }
  0xe3   :  { %v379_v20 = vadd.f32 %v2947_v16, %v378_v19 }
  0xe4   :  { %v698_v21 = vmax.f32 %v384_v18, 0.0 }
  0xe5   :  { %v697_v23 = vmax.f32 %v379_v20, 0.0  ;;  %v2200_v24 = vpop.f32.mrb[2].mxu0 }
  0xe6   :  { %v394_v26 = vadd.f32 %v2200_v24, %v2947_v16  ;;  %v388_v27 = vpop.f32.mrb[3].mxu0 }
  0xe7   :  { %v389_v28 = vadd.f32 %v2947_v16, %v388_v27  ;;  %v2955_v29 = vpack.c.bf16 %v698_v21, %v697_v23 }
  0xe8   :  { %v700_v31 = vmax.f32 %v394_v26, 0.0 }
  0xe9   :  { %v699_v33 = vmax.f32 %v389_v28, 0.0  ;;  %v2203_v34 = vpop.f32.mrb[4].mxu0 }
  0xea   :  { %v404_v35 = vadd.f32 %v2203_v34, %v2947_v16  ;;  %v398_v36 = vpop.f32.mrb[5].mxu0 }
  0xeb   :  { %v2966_v37 = vpack.c.bf16 %v700_v31, %v699_v33  ;;  %v399_v38 = vadd.f32 %v2947_v16, %v398_v36 }
  0xec   :  { %v702_v39 = vmax.f32 %v404_v35, 0.0 }
  0xed   :  { %v701_v40 = vmax.f32 %v399_v38, 0.0  ;;  %v2206_v41 = vpop.f32.mrb[6].mxu0 }
  0xee   :  { %v414_v42 = vadd.f32 %v2206_v41, %v2947_v16  ;;  %v408_v43 = vpop.f32.mrb[7].mxu0 }
  0xef   :  { %v2970_v44 = vpack.c.bf16 %v702_v39, %v701_v40  ;;  %v409_v45 = vadd.f32 %v2947_v16, %v408_v43 }
  0xf0   :  { %v704_v46 = vmax.f32 %v414_v42, 0.0 }
  0xf1   :  { %v703_v47 = vmax.f32 %v409_v45, 0.0  ;;  %v2209_v48 = vpop.f32.mrb[8].mxu0 }
  0xf2   :  { %v424_v49 = vadd.f32 %v2209_v48, %v2947_v16  ;;  %v418_v50 = vpop.f32.mrb[9].mxu0 }
  0xf3   :  { %v2974_v51 = vpack.c.bf16 %v704_v46, %v703_v47  ;;  %v419_v52 = vadd.f32 %v2947_v16, %v418_v50 }
  0xf4   :  { %v706_v53 = vmax.f32 %v424_v49, 0.0 }
  0xf5   :  { %v705_v54 = vmax.f32 %v419_v52, 0.0  ;;  %v2212_v55 = vpop.f32.mrb[10].mxu0 }
  0xf6   :  { %v434_v56 = vadd.f32 %v2212_v55, %v2947_v16  ;;  %v428_v57 = vpop.f32.mrb[11].mxu0 }
  0xf7   :  { %v2978_v58 = vpack.c.bf16 %v706_v53, %v705_v54  ;;  %v429_v59 = vadd.f32 %v2947_v16, %v428_v57 }
  0xf8   :  { %v708_v60 = vmax.f32 %v434_v56, 0.0 }
  0xf9   :  { %v707_v61 = vmax.f32 %v429_v59, 0.0  ;;  %v2215_v62 = vpop.f32.mrb[12].mxu0 }
  0xfa   :  { %v444_v63 = vadd.f32 %v2215_v62, %v2947_v16  ;;  %v438_v0 = vpop.f32.mrb[13].mxu0 }
  0xfb   :  { %v2982_v1 = vpack.c.bf16 %v708_v60, %v707_v61  ;;  %v439_v2 = vadd.f32 %v2947_v16, %v438_v0 }
  0xfc   :  { %v710_v3 = vmax.f32 %v444_v63, 0.0 }
  0xfd   :  { %v709_v4 = vmax.f32 %v439_v2, 0.0  ;;  %v2218_v5 = vpop.f32.mrb[14].mxu0 }
  0xfe   :  { %v454_v6 = vadd.f32 %v2218_v5, %v2947_v16  ;;  %v448_v7 = vpop.f32.mrb[15].mxu0 }
  0xff   :  { %v2986_v8 = vpack.c.bf16 %v710_v3, %v709_v4  ;;  %v449_v10 = vadd.f32 %v2947_v16, %v448_v7 }
 0x100   :  { %v712_v11 = vmax.f32 %v454_v6, 0.0 }
 0x101   :  { %v711_v12 = vmax.f32 %v449_v10, 0.0  ;;  %v2221_v13 = vpop.f32.mrb[16].mxu0 }
 0x102   :  { %v464_v17 = vadd.f32 %v2221_v13, %v2947_v16  ;;  %v458_v18 = vpop.f32.mrb[17].mxu0 }
 0x103   :  { %v2990_v19 = vpack.c.bf16 %v712_v11, %v711_v12  ;;  %v459_v20 = vadd.f32 %v2947_v16, %v458_v18 }
 0x104   :  { %v714_v21 = vmax.f32 %v464_v17, 0.0 }
 0x105   :  { %v713_v22 = vmax.f32 %v459_v20, 0.0  ;;  %v2224_v23 = vpop.f32.mrb[18].mxu0 }
 0x106   :  { %v474_v24 = vadd.f32 %v2224_v23, %v2947_v16  ;;  %v468_v25 = vpop.f32.mrb[19].mxu0 }
 0x107   :  { %v469_v26 = vadd.f32 %v2947_v16, %v468_v25  ;;  %v2410_v27 = vpack.c.bf16 %v714_v21, %v713_v22 }
 0x108   :  { %v716_v28 = vmax.f32 %v474_v24, 0.0 }
 0x109   :  { %v715_v31 = vmax.f32 %v469_v26, 0.0  ;;  %v2227_v33 = vpop.f32.mrb[20].mxu0  ;;  %2411 = vmatprep.subr.bf16.mxu1 %v2410_v27 }
 0x10a   :  { %v484_v34 = vadd.f32 %v2227_v33, %v2947_v16  ;;  %v478_v35 = vpop.f32.mrb[21].mxu0  ;;  %2413 = vmatpush3.bf16.msra.mxu1 %v2955_v29 }
 0x10b   :  { %v2414_v36 = vpack.c.bf16 %v716_v28, %v715_v31  ;;  %v479_v38 = vadd.f32 %v2947_v16, %v478_v35 }
 0x10c   :  { %v718_v39 = vmax.f32 %v484_v34, 0.0 }
 0x10d   :  { %v717_v40 = vmax.f32 %v479_v38, 0.0  ;;  %v2230_v41 = vpop.f32.mrb[22].mxu0  ;;  %2415 = vmatprep.subr.bf16.mxu1 %v2414_v36 }
 0x10e   :  { %v494_v42 = vadd.f32 %v2230_v41, %v2947_v16  ;;  %v488_v43 = vpop.f32.mrb[23].mxu0  ;;  %2417 = vmatpush3.bf16.msra.mxu1 %v2966_v37 }
 0x10f   :  { %v2418_v45 = vpack.c.bf16 %v718_v39, %v717_v40  ;;  %v489_v46 = vadd.f32 %v2947_v16, %v488_v43 }
 0x110   :  { %v720_v47 = vmax.f32 %v494_v42, 0.0 }
 0x111   :  { %v719_v48 = vmax.f32 %v489_v46, 0.0  ;;  %v2233_v49 = vpop.f32.mrb[24].mxu0  ;;  %2419 = vmatprep.subr.bf16.mxu1 %v2418_v45 }
 0x112   :  { %v504_v29 = vadd.f32 %v2233_v49, %v2947_v16  ;;  %v498_v50 = vpop.f32.mrb[25].mxu0  ;;  %2421 = vmatpush3.bf16.msra.mxu1 %v2970_v44 }
 0x113   :  { %v2422_v52 = vpack.c.bf16 %v720_v47, %v719_v48  ;;  %v499_v53 = vadd.f32 %v2947_v16, %v498_v50 }
 0x114   :  { %v722_v54 = vmax.f32 %v504_v29, 0.0 }
 0x115   :  { %v721_v55 = vmax.f32 %v499_v53, 0.0  ;;  %v2236_v56 = vpop.f32.mrb[26].mxu0  ;;  %2423 = vmatprep.subr.bf16.mxu1 %v2422_v52 }
 0x116   :  { %v514_v37 = vadd.f32 %v2236_v56, %v2947_v16  ;;  %v508_v57 = vpop.f32.mrb[27].mxu0  ;;  %2425 = vmatpush3.bf16.msra.mxu1 %v2974_v51 }
 0x117   :  { %v2426_v59 = vpack.c.bf16 %v722_v54, %v721_v55  ;;  %v509_v60 = vadd.f32 %v2947_v16, %v508_v57 }
 0x118   :  { %v724_v61 = vmax.f32 %v514_v37, 0.0 }
 0x119   :  { %v723_v62 = vmax.f32 %v509_v60, 0.0  ;;  %v2239_v63 = vpop.f32.mrb[28].mxu0  ;;  %2427 = vmatprep.subr.bf16.mxu1 %v2426_v59 }
 0x11a   :  { %v524_v44 = vadd.f32 %v2239_v63, %v2947_v16  ;;  %v518_v0 = vpop.f32.mrb[29].mxu0  ;;  %2429 = vmatpush3.bf16.msra.mxu1 %v2978_v58 }
 0x11b   :  { %v2430_v2 = vpack.c.bf16 %v724_v61, %v723_v62  ;;  %v519_v3 = vadd.f32 %v2947_v16, %v518_v0 }
 0x11c   :  { %v726_v4 = vmax.f32 %v524_v44, 0.0 }
 0x11d   :  { %v725_v5 = vmax.f32 %v519_v3, 0.0  ;;  %v2242_v6 = vpop.f32.mrb[30].mxu0  ;;  %2431 = vmatprep.subr.bf16.mxu1 %v2430_v2 }
 0x11e   :  { %v534_v51 = vadd.f32 %v2242_v6, %v2947_v16  ;;  %v528_v7 = vpop.f32.mrb[31].mxu0  ;;  %2433 = vmatpush3.bf16.msra.mxu1 %v2982_v1 }
 0x11f   :  { %v2434_v10 = vpack.c.bf16 %v726_v4, %v725_v5  ;;  %v529_v11 = vadd.f32 %v2947_v16, %v528_v7 }
 0x120   :  { %v728_v12 = vmax.f32 %v534_v51, 0.0 }
 0x121   :  { %v727_v13 = vmax.f32 %v529_v11, 0.0  ;;  %v2245_v17 = vpop.f32.mrb[32].mxu0  ;;  %2435 = vmatprep.subr.bf16.mxu1 %v2434_v10 }
 0x122   :  { %v544_v58 = vadd.f32 %v2245_v17, %v2947_v16  ;;  %v538_v18 = vpop.f32.mrb[33].mxu0  ;;  %2437 = vmatpush3.bf16.msra.mxu1 %v2986_v8 }
 0x123   :  { %v2438_v20 = vpack.c.bf16 %v728_v12, %v727_v13  ;;  %v539_v21 = vadd.f32 %v2947_v16, %v538_v18 }
 0x124   :  { %v730_v22 = vmax.f32 %v544_v58, 0.0 }
 0x125   :  { %v729_v23 = vmax.f32 %v539_v21, 0.0  ;;  %v2248_v24 = vpop.f32.mrb[34].mxu0  ;;  %2439 = vmatprep.subr.bf16.mxu1 %v2438_v20 }
 0x126   :  { %v554_v1 = vadd.f32 %v2248_v24, %v2947_v16  ;;  %v548_v25 = vpop.f32.mrb[35].mxu0  ;;  %2441 = vmatpush3.bf16.msra.mxu1 %v2990_v19 }
 0x127   :  { %v3018_v26 = vpack.c.bf16 %v730_v22, %v729_v23  ;;  %v549_v27 = vadd.f32 %v2947_v16, %v548_v25 }
 0x128   :  { %v732_v28 = vmax.f32 %v554_v1, 0.0 }
 0x129   :  { %v731_v31 = vmax.f32 %v549_v27, 0.0  ;;  %v2251_v33 = vpop.f32.mrb[36].mxu0  ;;  %1973 = vmatmul.mubr.msk.f32.vlgmr.msra.gmra.mrb[0].mxu1 %vm2940_vm7, %v2588_v14  ;;  %vm1883_vm7 = vcmask 523264  }
 0x12a   :  { %v564_v8 = vadd.f32 %v2251_v33, %v2947_v16  ;;  %v558_v34 = vpop.f32.mrb[37].mxu0  ;;  %1974 = vmatprep.mubr.msk.f32.mxu1 %vm2957_vm10, %v2588_v14  ;;  %vm1889_vm10 = vcmask 916480  }
 0x12b   :  { %v3028_v35 = vpack.c.bf16 %v732_v28, %v731_v31  ;;  %v559_v19 = vadd.f32 %v2947_v16, %v558_v34 }
 0x12c   :  { %v734_v36 = vmax.f32 %v564_v8, 0.0 }
 0x12d   :  { %v733_v38 = vmax.f32 %v559_v19, 0.0  ;;  %v2254_v39 = vpop.f32.mrb[38].mxu0 }
 0x12e   :  { %v574_v40 = vadd.f32 %v2254_v39, %v2947_v16  ;;  %v568_v41 = vpop.f32.mrb[39].mxu0 }
 0x12f   :  { %v3032_v42 = vpack.c.bf16 %v734_v36, %v733_v38  ;;  %v569_v15 = vadd.f32 %v2947_v16, %v568_v41 }
 0x130   :  { %v736_v43 = vmax.f32 %v574_v40, 0.0 }
 0x131   :  { %v735_v45 = vmax.f32 %v569_v15, 0.0  ;;  %v2257_v46 = vpop.f32.mrb[40].mxu0 }
 0x132   :  { %v584_v30 = vadd.f32 %v2257_v46, %v2947_v16  ;;  %v578_v47 = vpop.f32.mrb[41].mxu0 }
 0x133   :  { %v3036_v48 = vpack.c.bf16 %v736_v43, %v735_v45  ;;  %v579_v49 = vadd.f32 %v2947_v16, %v578_v47 }
 0x134   :  { %v738_v29 = vmax.f32 %v584_v30, 0.0 }
 0x135   :  { %v737_v50 = vmax.f32 %v579_v49, 0.0  ;;  %v2260_v52 = vpop.f32.mrb[42].mxu0 }
 0x136   :  { %v594_v53 = vadd.f32 %v2260_v52, %v2947_v16  ;;  %v588_v54 = vpop.f32.mrb[43].mxu0 }
 0x137   :  { %v3040_v55 = vpack.c.bf16 %v738_v29, %v737_v50  ;;  %v589_v56 = vadd.f32 %v2947_v16, %v588_v54 }
 0x138   :  { %v740_v37 = vmax.f32 %v594_v53, 0.0 }
 0x139   :  { %v739_v57 = vmax.f32 %v589_v56, 0.0  ;;  %v2263_v59 = vpop.f32.mrb[44].mxu0 }
 0x13a   :  { %v604_v60 = vadd.f32 %v2263_v59, %v2947_v16  ;;  %v598_v61 = vpop.f32.mrb[45].mxu0 }
 0x13b   :  { %v3044_v62 = vpack.c.bf16 %v740_v37, %v739_v57  ;;  %v599_v63 = vadd.f32 %v2947_v16, %v598_v61 }
 0x13c   :  { %v742_v44 = vmax.f32 %v604_v60, 0.0 }
 0x13d   :  { %v741_v0 = vmax.f32 %v599_v63, 0.0  ;;  %v2266_v2 = vpop.f32.mrb[46].mxu0 }
 0x13e   :  { %v614_v3 = vadd.f32 %v2266_v2, %v2947_v16  ;;  %v608_v4 = vpop.f32.mrb[47].mxu0 }
 0x13f   :  { %v3048_v5 = vpack.c.bf16 %v742_v44, %v741_v0  ;;  %v609_v6 = vadd.f32 %v2947_v16, %v608_v4 }
 0x140   :  { %v744_v51 = vmax.f32 %v614_v3, 0.0 }
 0x141   :  { %v743_v7 = vmax.f32 %v609_v6, 0.0  ;;  %v2269_v10 = vpop.f32.mrb[48].mxu0 }
 0x142   :  { %v624_v11 = vadd.f32 %v2269_v10, %v2947_v16  ;;  %v618_v12 = vpop.f32.mrb[49].mxu0  ;;  %v1024_v10 = vld [vmem:[%s3241_s6 + $0x8] sm:$0xff] }
 0x143   :  { %v3052_v13 = vpack.c.bf16 %v744_v51, %v743_v7  ;;  %v619_v17 = vadd.f32 %v2947_v16, %v618_v12  ;;  %v2589_v7 = vmov 0.0  }
 0x144   :  { %v746_v58 = vmax.f32 %v624_v11, 0.0  ;;  %v2474_v11 = vpack.c.bf16 %v1024_v10, %v1023_v32 }
 0x145   :  { %v745_v18 = vmax.f32 %v619_v17, 0.0  ;;  %v2272_v20 = vpop.f32.mrb[50].mxu0 }
 0x146   :  { %v634_v21 = vadd.f32 %v2272_v20, %v2947_v16  ;;  %v628_v22 = vpop.f32.mrb[51].mxu0 }
 0x147   :  { %v2442_v23 = vpack.c.bf16 %v746_v58, %v745_v18  ;;  %v629_v24 = vadd.f32 %v2947_v16, %v628_v22 }
 0x148   :  { %v748_v1 = vmax.f32 %v634_v21, 0.0 }
 0x149   :  { %v747_v25 = vmax.f32 %v629_v24, 0.0  ;;  %v2275_v27 = vpop.f32.mrb[52].mxu0  ;;  %2443 = vmatprep.subr.bf16.mxu1 %v2442_v23  ;;  %v2592_v23 = vmov 0.0|0.0   ;;  %v1107_v24 = vld [vmem:[%s3242_s7] sm:$0xff] }
 0x14a   :  { %v644_v28 = vadd.f32 %v2275_v27, %v2947_v16  ;;  %v638_v31 = vpop.f32.mrb[53].mxu0  ;;  %2445 = vmatpush3.bf16.msra.mxu1 %v3018_v26 }
 0x14b   :  { %v2446_v33 = vpack.c.bf16 %v748_v1, %v747_v25  ;;  %v639_v8 = vadd.f32 %v2947_v16, %v638_v31  ;;  %v1108_v1 = vld [vmem:[%s3242_s7 + $0x8] sm:$0xff] }
 0x14c   :  { %v750_v34 = vmax.f32 %v644_v28, 0.0  ;;  %v3108_v28 = vpack.c.bf16 %v1108_v1, %v1107_v24 }
 0x14d   :  { %v749_v19 = vmax.f32 %v639_v8, 0.0  ;;  %v2278_v36 = vpop.f32.mrb[54].mxu0  ;;  %2447 = vmatprep.subr.bf16.mxu1 %v2446_v33  ;;  %v1109_v33 = vld [vmem:[%s3242_s7 + $0x10] sm:$0xff]  ;;  %v1110_v8 = vld [vmem:[%s3242_s7 + $0x18] sm:$0xff] }
 0x14e   :  { %v654_v38 = vadd.f32 %v2278_v36, %v2947_v16  ;;  %v648_v39 = vpop.f32.mrb[55].mxu0  ;;  %2449 = vmatpush3.bf16.msra.mxu1 %v3028_v35 }
 0x14f   :  { %v2450_v40 = vpack.c.bf16 %v750_v34, %v749_v19  ;;  %v649_v41 = vadd.f32 %v2947_v16, %v648_v39  ;;  %v1976_v34 = vld [vmem:[%s3239_s4] ss:$0 sm:$0xff] }
 0x150   :  { %v752_v15 = vmax.f32 %v654_v38, 0.0 }
 0x151   :  { %v751_v43 = vmax.f32 %v649_v41, 0.0  ;;  %v2281_v45 = vpop.f32.mrb[56].mxu0  ;;  %2451 = vmatprep.subr.bf16.mxu1 %v2450_v40  ;;  %v3142_v41 = vld [vmem:[%s3243_s8] ss:$0 sm:$0xff] }
 0x152   :  { %v664_v26 = vadd.f32 %v2281_v45, %v2947_v16  ;;  %v658_v46 = vpop.f32.mrb[57].mxu0  ;;  %2453 = vmatpush3.bf16.msra.mxu1 %v3032_v42 }
 0x153   :  { %v2454_v30 = vpack.c.bf16 %v752_v15, %v751_v43  ;;  %v659_v47 = vadd.f32 %v2947_v16, %v658_v46 }
 0x154   :  { %v754_v49 = vmax.f32 %v664_v26, 0.0 }
 0x155   :  { %v753_v29 = vmax.f32 %v659_v47, 0.0  ;;  %v2284_v50 = vpop.f32.mrb[58].mxu0  ;;  %2455 = vmatprep.subr.bf16.mxu1 %v2454_v30 }
 0x156   :  { %v674_v35 = vadd.f32 %v2284_v50, %v2947_v16  ;;  %v668_v52 = vpop.f32.mrb[59].mxu0  ;;  %2457 = vmatpush3.bf16.msra.mxu1 %v3036_v48 }
 0x157   :  { %v2458_v53 = vpack.c.bf16 %v754_v49, %v753_v29  ;;  %v669_v54 = vadd.f32 %v2947_v16, %v668_v52 }
 0x158   :  { %v756_v56 = vmax.f32 %v674_v35, 0.0 }
 0x159   :  { %v755_v37 = vmax.f32 %v669_v54, 0.0  ;;  %v2287_v57 = vpop.f32.mrb[60].mxu0  ;;  %2459 = vmatprep.subr.bf16.mxu1 %v2458_v53 }
 0x15a   :  { %v684_v42 = vadd.f32 %v2287_v57, %v2947_v16  ;;  %v678_v59 = vpop.f32.mrb[61].mxu0  ;;  %2461 = vmatpush3.bf16.msra.mxu1 %v3040_v55 }
 0x15b   :  { %v2462_v60 = vpack.c.bf16 %v756_v56, %v755_v37  ;;  %v679_v61 = vadd.f32 %v2947_v16, %v678_v59 }
 0x15c   :  { %v758_v63 = vmax.f32 %v684_v42, 0.0 }
 0x15d   :  { %v757_v44 = vmax.f32 %v679_v61, 0.0  ;;  %v2290_v0 = vpop.f32.mrb[62].mxu0  ;;  %2463 = vmatprep.subr.bf16.mxu1 %v2462_v60 }
 0x15e   :  { %v694_v48 = vadd.f32 %v2290_v0, %v2947_v16  ;;  %v688_v2 = vpop.f32.mrb[63].mxu0  ;;  %2465 = vmatpush3.bf16.msra.mxu1 %v3044_v62  ;;  %v1009_v62 = vld [vmem:[%s3240_s5] sm:$0xff] }
 0x15f   :  { %v2466_v3 = vpack.c.bf16 %v758_v63, %v757_v44  ;;  %v689_v4 = vadd.f32 %v2947_v16, %v688_v2  ;;  %v927_v16 = vld [vmem:[%s3238_s3] sm:$0xff]  ;;  %s2599_s3 = smov 96  }
 0x160   :  { %v760_v6 = vmax.f32 %v694_v48, 0.0 }
 0x161   :  { %v759_v51 = vmax.f32 %v689_v4, 0.0  ;;  %2467 = vmatprep.subr.bf16.mxu1 %v2466_v3 }
 0x162   :  { %2469 = vmatpush3.bf16.msra.mxu1 %v3048_v5  ;;  %v2591_v5 = vmov 0  }
 0x163   :  { %v2470_v55 = vpack.c.bf16 %v760_v6, %v759_v51  ;;  %2547 = vset.pattern.permute.xlu0 %v2591_v5 }
 0x164   :  { %1012 = vperm.xlu0 %2547, %v1009_v62  }
 0x165   :  { %2471 = vmatprep.subr.bf16.mxu1 %v2470_v55 }
 0x166   :  { %2473 = vmatpush3.bf16.msra.mxu1 %v3052_v13 }
 0x167   :  { %2291 = vmatprep.subr.mxu1 %v2589_v7 }
 0x169   :  { %1975 = vmatmul.mubr.msk.f32.vlgmr.msra.gmra.mrb[2].mxu1 %vm2961_vm13, %v2588_v14  ;;  %v1010_v14 = vld [vmem:[%s3240_s5 + $0x8] sm:$0xff]  ;;  %s1898_s5 = sshll.u32 %s2600_s23, 4  ;;  %s1899_s5 = int_to_ptr.vmem [resolvable:$true] %s1898_s5 }
 0x16a   :  { %2292 = vmatpush3.msra.mxu1 %v927_v16  ;;  %2293 = vmatprep.mubr.msk.f32.mxu1 %vm2590_vm14, %v2589_v7  ;;  %s2564_s6 = scalar_lea.vmem %s1899_s5, 32  ;;  %p2569_p1 = scmp.lt.s32.totalorder %s1899_s5, %s1899_s5 }
 0x16b   :  { %1015 = vperm.xlu0 %2547, %v1010_v14   ;;  %2475 = vmatprep.subr.bf16.mxu1 %v2474_v11  ;;  %p2565_p0 = scmp.ne.s32.totalorder %s1899_s5, %s2564_s6  ;;  %p2570_p2 = scmp.lt.s32.totalorder %s2564_s6, %s2564_s6 }
 0x16d   :  { %p2571_p3 = por %p2570_p2, %p2569_p1 }
 0x16f   :  { %p2572_p4 = pnand %p2571_p3, %p2565_p0 }
 0x1e3   :  { %v1013_v22 = vpop.permute.xlu0 %1012 }
 0x1e4   :  { %vm1017_vm2 = vcmp.eq.s32.totalorder %v2934_v9, %v1013_v22 }
 0x1e5   :  { %v1978_v25 = vsel %vm1017_vm2, 1.0, %v2589_v7 }
 0x1ea   :  { %v1016_v27 = vpop.permute.xlu0 %1015 }
 0x1eb   :  { %vm1018_vm3 = vcmp.eq.s32.totalorder %v2934_v9, %v1016_v27  ;;  %v3123_v9 = vpack.c.bf16 %v1110_v8, %v1109_v33 }
 0x1ec   :  { %v1979_v31 = vsel %vm1018_vm3, 1.0, %v2589_v7 }
 0x1fc   :  { %v2095_v12 = vpop.f32.mrb[0].mxu1 }
 0x1fd   :  { %v2096_v13 = vpop.f32.mrb[1].mxu1 }
 0x1fe   :  { %v2097_v17 = vadd.f32 %v2096_v13, %v2095_v12 }
 0x23c   :  { %v2130_v58 = vpop.f32.mrb[2].mxu1 }
 0x23d   :  { %v2131_v18 = vpop.f32.mrb[3].mxu1 }
 0x23e   :  { %v2132_v20 = vadd.f32 %v2131_v18, %v2130_v58  ;;  %v1758_v58 = vld [vmem:[%s3244_s9] sm:$0xff]  ;;  %v1759_v18 = vld [vmem:[%s3244_s9 + $0x8] sm:$0xff] }
 0x240   :  { %v924_v21 = vadd.f32 %v2132_v20, %v2097_v17  ;;  %v1760_v20 = vld [vmem:[%s3244_s9 + $0x10] sm:$0xff] }
 0x242   :  { %2294 = vmatmul.mubr.msk.f32.vlgmr.msra.gmra.mrb[4].mxu1 %vm935_vm15, %v924_v21  ;;  %v2526_v21 = vpack.c.bf16 %v1759_v18, %v1758_v58 }
 0x243   :  { %2477 = vmatpush3.bf16.msra.mxu1 %v2474_v11  ;;  %2300 = vmatprep.mubr.msk.f32.mxu1 %vm1025_vm0, %v1978_v25 }
 0x244   :  { %2478 = vmatprep.subr.bf16.mxu1 %v2592_v23  ;;  %2527 = vmatprep.subr.bf16.mxu0 %v2526_v21 }
 0x245   :  { %2529 = vmatpush3.bf16.msra.mxu0 %v2526_v21 }
 0x246   :  { %2301 = vmatmul.mubr.msk.f32.vlgmr.msra.gmra.mrb[6].mxu1 %vm1025_vm0, %v1979_v31 }
 0x247   :  { %2480 = vmatpush3.bf16.msra.mxu1 %v3108_v28  ;;  %2311 = vmatprep.mubr.msk.f32.mxu1 %vm2590_vm14, %v2589_v7 }
 0x248   :  { %2481 = vmatprep.subr.bf16.mxu1 %v2592_v23 }
 0x24b   :  { %2483 = vmatpush3.bf16.msra.mxu1 %v3123_v9 }
 0x24c   :  { %2484 = vmatprep.subr.bf16.mxu1 %v2592_v23 }
 0x315   :  { %v1005_v19 = vpop.f32.mrb[4].mxu1 }
 0x316   :  { %v1006_v36 = vadd.f32 %v1976_v34, %v1005_v19  ;;  %v2295_v38 = vpop.f32.mrb[5].mxu1 }
 0x318   :  { %2312 = vmatmul.mubr.msk.f32.vlgmr.msra.gmra.mrb[8].mxu1 %vm1112_vm4, %v1006_v36 }
 0x319   :  { %2486 = vmatpush3.bf16.msra.mxu1 %v3108_v28  ;;  %2322 = vmatprep.mubr.msk.f32.mxu1 %vm2590_vm14, %v2589_v7  ;;  %v3135_v39 = vpop.f32.mrb[6].mxu1 }
 0x31a   :  { %2487 = vmatprep.subr.bf16.mxu1 %v2592_v23  ;;  %v1098_v40 = vpop.f32.mrb[7].mxu1 }
 0x31d   :  { %2489 = vmatpush3.bf16.msra.mxu1 %v3123_v9 }
 0x31e   :  { %2490 = vmatprep.subr.bf16.mxu1 %v2592_v23 }
 0x3eb   :  { %v1182_v15 = vpop.f32.mrb[8].mxu1 }
 0x3ec   :  { %v1186_v43 = vadd.f32 %v1182_v15, %v1098_v40  ;;  %v2313_v45 = vpop.f32.mrb[9].mxu1 }
 0x3ee   :  { %v1193_v26 = vadd.f32 %v3142_v41, %v1186_v43  ;;  %v1991_v43 = vld [vmem:[%s3245_s10] ss:$0 sm:$0xff]  ;;  %s2598_s10 = smov 112  }
 0x3f0   :  { %2548 = vtanh.f32 %v1193_v26 }
 0x3fa   :  { %v2549_v46 = vpop.eup %2548 }
 0x3fb   :  { %2323 = vmatmul.mubr.msk.f32.vlgmr.msra.gmra.mrb[10].mxu1 %vm1112_vm4, %v2549_v46 }
 0x3fc   :  { %2492 = vmatpush3.bf16.msra.mxu1 %v3108_v28  ;;  %2333 = vmatprep.mubr.msk.f32.mxu1 %vm2590_vm14, %v2589_v7 }
 0x3fd   :  { %2493 = vmatprep.subr.bf16.mxu1 %v2592_v23 }
 0x400   :  { %2495 = vmatpush3.bf16.msra.mxu1 %v3123_v9 }
 0x401   :  { %2496 = vmatprep.subr.bf16.mxu1 %v2592_v23 }
 0x4ce   :  { %v1264_v30 = vpop.f32.mrb[10].mxu1 }
 0x4cf   :  { %v1269_v47 = vrot.slane %v1264_v30, 6  ;;  %v2324_v49 = vpop.f32.mrb[11].mxu1 }
 0x4d1   :  { %v1271_v29 = vadd.f32 %v1269_v47, %v1098_v40 }
 0x4d3   :  { %v1272_v50 = vadd.f32 %v3142_v41, %v1271_v29 }
 0x4d5   :  { %2550 = vtanh.f32 %v1272_v50 }
 0x4df   :  { %v2551_v35 = vpop.eup %2550 }
 0x4e0   :  { %v1275_v52 = vrot.slane %v2551_v35, 2  ;;  %v1751_v59 = vsel %vm1750_vm5, %v2549_v46, %v2551_v35 }
 0x4e2   :  { %2334 = vmatmul.mubr.msk.f32.vlgmr.msra.gmra.mrb[12].mxu1 %vm1112_vm4, %v1275_v52 }
 0x4e3   :  { %2498 = vmatpush3.bf16.msra.mxu1 %v3108_v28  ;;  %2344 = vmatprep.mubr.msk.f32.mxu1 %vm2590_vm14, %v2589_v7 }
 0x4e4   :  { %2499 = vmatprep.subr.bf16.mxu1 %v2592_v23 }
 0x4e7   :  { %2501 = vmatpush3.bf16.msra.mxu1 %v3123_v9 }
 0x4e8   :  { %2502 = vmatprep.subr.bf16.mxu1 %v2592_v23 }
 0x5b5   :  { %v1344_v53 = vpop.f32.mrb[12].mxu1 }
 0x5b6   :  { %v1349_v54 = vrot.slane %v1344_v53, 4  ;;  %v2335_v56 = vpop.f32.mrb[13].mxu1 }
 0x5b8   :  { %v1351_v37 = vadd.f32 %v1349_v54, %v1098_v40 }
 0x5ba   :  { %v1352_v57 = vadd.f32 %v3142_v41, %v1351_v37 }
 0x5bc   :  { %2552 = vtanh.f32 %v1352_v57 }
 0x5c6   :  { %v2553_v42 = vpop.eup %2552 }
 0x5c7   :  { %v1355_v60 = vrot.slane %v2553_v42, 4  ;;  %v1752_v61 = vsel %vm308_vm1, %v1751_v59, %v2553_v42 }
 0x5c9   :  { %2345 = vmatmul.mubr.msk.f32.vlgmr.msra.gmra.mrb[14].mxu1 %vm1112_vm4, %v1355_v60 }
 0x5ca   :  { %2504 = vmatpush3.bf16.msra.mxu1 %v3108_v28  ;;  %2355 = vmatprep.mubr.msk.f32.mxu1 %vm2590_vm14, %v2589_v7 }
 0x5cb   :  { %2505 = vmatprep.subr.bf16.mxu1 %v2592_v23 }
 0x5ce   :  { %2507 = vmatpush3.bf16.msra.mxu1 %v3123_v9 }
 0x5cf   :  { %2508 = vmatprep.subr.bf16.mxu1 %v2592_v23 }
 0x69c   :  { %v1424_v63 = vpop.f32.mrb[14].mxu1 }
 0x69d   :  { %v1429_v44 = vrot.slane %v1424_v63, 2  ;;  %v2346_v0 = vpop.f32.mrb[15].mxu1 }
 0x69f   :  { %v1431_v48 = vadd.f32 %v1429_v44, %v1098_v40 }
 0x6a1   :  { %v1432_v2 = vadd.f32 %v3142_v41, %v1431_v48 }
 0x6a3   :  { %2554 = vtanh.f32 %v1432_v2 }
 0x6ad   :  { %v2555_v3 = vpop.eup %2554 }
 0x6ae   :  { %v1754_v4 = vsel %vm1753_vm6, %v1752_v61, %v2555_v3  ;;  %v1435_v6 = vrot.slane %v2555_v3, 6 }
 0x6af   :  { %2399 = vmatprep.mubr.msk.f32.mxu0 %vm1112_vm4, %v1754_v4 }
 0x6b0   :  { %2356 = vmatmul.mubr.msk.f32.vlgmr.msra.gmra.mrb[16].mxu1 %vm1112_vm4, %v1435_v6 }
 0x6b1   :  { %2510 = vmatpush3.bf16.msra.mxu1 %v3108_v28  ;;  %2366 = vmatprep.mubr.msk.f32.mxu1 %vm2590_vm14, %v2589_v7 }
 0x6b2   :  { %2511 = vmatprep.subr.bf16.mxu1 %v2592_v23 }
 0x6b5   :  { %2513 = vmatpush3.bf16.msra.mxu1 %v3123_v9 }
 0x6b6   :  { %2514 = vmatprep.subr.bf16.mxu1 %v2592_v23 }
 0x783   :  { %v1504_v51 = vpop.f32.mrb[16].mxu1 }
 0x784   :  { %v1508_v55 = vadd.f32 %v3135_v39, %v1504_v51  ;;  %v2357_v16 = vpop.f32.mrb[17].mxu1 }
 0x786   :  { %v1509_v62 = vadd.f32 %v3142_v41, %v1508_v55 }
 0x788   :  { %2556 = vtanh.f32 %v1509_v62 }
 0x792   :  { %v2557_v5 = vpop.eup %2556 }
 0x793   :  { %2367 = vmatmul.mubr.msk.f32.vlgmr.msra.gmra.mrb[18].mxu1 %vm1112_vm4, %v2557_v5 }
 0x794   :  { %2516 = vmatpush3.bf16.msra.mxu1 %v3108_v28  ;;  %2377 = vmatprep.mubr.msk.f32.mxu1 %vm2590_vm14, %v2589_v7 }
 0x795   :  { %2517 = vmatprep.subr.bf16.mxu1 %v2592_v23 }
 0x798   :  { %2519 = vmatpush3.bf16.msra.mxu1 %v3123_v9 }
 0x799   :  { %2520 = vmatprep.subr.bf16.mxu1 %v2592_v23 }
 0x866   :  { %v1580_v14 = vpop.f32.mrb[18].mxu1 }
 0x867   :  { %v1585_v32 = vrot.slane %v1580_v14, 6  ;;  %v2368_v10 = vpop.f32.mrb[19].mxu1 }
 0x869   :  { %v1587_v11 = vadd.f32 %v3135_v39, %v1585_v32 }
 0x86b   :  { %v1588_v12 = vadd.f32 %v3142_v41, %v1587_v11 }
 0x86d   :  { %2558 = vtanh.f32 %v1588_v12 }
 0x877   :  { %v2559_v13 = vpop.eup %2558 }
 0x878   :  { %v1591_v17 = vrot.slane %v2559_v13, 2  ;;  %v1755_v31 = vsel %vm1750_vm5, %v2557_v5, %v2559_v13 }
 0x87a   :  { %2378 = vmatmul.mubr.msk.f32.vlgmr.msra.gmra.mrb[20].mxu1 %vm1112_vm4, %v1591_v17 }
 0x87b   :  { %2522 = vmatpush3.bf16.msra.mxu1 %v3108_v28  ;;  %2388 = vmatprep.mubr.msk.f32.mxu1 %vm2590_vm14, %v2589_v7  ;;  %v1761_v7 = vld [vmem:[%s3244_s9 + $0x18] sm:$0xff] }
 0x87c   :  { %2523 = vmatprep.subr.bf16.mxu1 %v2592_v23  ;;  %v2530_v22 = vpack.c.bf16 %v1761_v7, %v1760_v20 }
 0x87e   :  { %2531 = vmatprep.subr.bf16.mxu0 %v2530_v22 }
 0x87f   :  { %2525 = vmatpush3.bf16.msra.mxu1 %v3123_v9  ;;  %2533 = vmatpush3.bf16.msra.mxu0 %v2530_v22 }
 0x94d   :  { %v1660_v23 = vpop.f32.mrb[20].mxu1 }
 0x94e   :  { %v1665_v24 = vrot.slane %v1660_v23, 4  ;;  %v2379_v1 = vpop.f32.mrb[21].mxu1 }
 0x950   :  { %v1667_v25 = vadd.f32 %v3135_v39, %v1665_v24 }
 0x952   :  { %v1668_v27 = vadd.f32 %v3142_v41, %v1667_v25 }
 0x954   :  { %2560 = vtanh.f32 %v1668_v27 }
 0x95e   :  { %v2561_v28 = vpop.eup %2560 }
 0x95f   :  { %v1671_v33 = vrot.slane %v2561_v28, 4  ;;  %v1756_v8 = vsel %vm308_vm1, %v1755_v31, %v2561_v28  ;;  %vm1881_vm1 = vcmask 392192  }
 0x961   :  { %2389 = vmatmul.mubr.msk.f32.vlgmr.msra.gmra.mrb[22].mxu1 %vm1112_vm4, %v1671_v33 }
 0xa34   :  { %v1740_v9 = vpop.f32.mrb[22].mxu1 }
 0xa35   :  { %v1745_v34 = vrot.slane %v1740_v9, 2  ;;  %v2390_v19 = vpop.f32.mrb[23].mxu1 }
 0xa37   :  { %v1747_v36 = vadd.f32 %v3135_v39, %v1745_v34 }
 0xa39   :  { %v1748_v38 = vadd.f32 %v3142_v41, %v1747_v36 }
 0xa3b   :  { %2562 = vtanh.f32 %v1748_v38 }
 0xa45   :  { %v2563_v40 = vpop.eup %2562 }
 0xa46   :  { %v1757_v15 = vsel %vm1753_vm6, %v1756_v8, %v2563_v40 }
 0xa47   :  { %2400 = vmatmul.mubr.msk.f32.vlgmr.msra.gmra.mrb[64].mxu0 %vm1112_vm4, %v1757_v15 }
 0xb1a   :  { %v2401_v45 = vpop.f32.mrb[64].mxu0 }
 0xb1b   :  { %v1847_v26 = vadd.f32 %v2401_v45, %v1991_v43  ;;  %v1841_v46 = vpop.f32.mrb[65].mxu0 }
 0xb1c   :  { %v1842_v30 = vadd.f32 %v1991_v43, %v1841_v46 }
 0xb1d   :  { %1864 = vrot.lane.b32.xlu1 %v1847_v26, %s2593_s18  ;;  %v1867_v47 = vrot.slane %v1847_v26, 2  ;;  %v1875_v29 = vrot.slane %v1847_v26, 6  ;;  %v1871_v50 = vrot.slane %v1847_v26, 4 }
 0xb1e   :  { %v1851_v39 = vrot.slane %v1842_v30, 2  ;;  %v1859_v41 = vrot.slane %v1842_v30, 6  ;;  %v1855_v49 = vrot.slane %v1842_v30, 4 }
 0xb1f   :  { %1868 = vrot.lane.b32.xlu0 %v1867_v47, %s2594_s19 }
 0xb21   :  { %1852 = vrot.lane.b32.xlu1 %v1851_v39, %s2595_s20 }
 0xb23   :  { %1860 = vrot.lane.b32.xlu0 %v1859_v41, %s2596_s21 }
 0xb25   :  { %1856 = vrot.lane.b32.xlu1 %v1855_v49, %s2597_s22 }
 0xb27   :  { %1876 = vrot.lane.b32.xlu0 %v1875_v29, %s2598_s10 }
 0xb29   :  { %1872 = vrot.lane.b32.xlu1 %v1871_v50, %s2599_s3 }
 0xb8f   :  { %v1865_v35 = vpop.permute.xlu1 %1864 }
 0xb91   :  { %v1869_v52 = vpop.permute.xlu0 %1868 }
 0xb93   :  { %v1853_v53 = vpop.permute.xlu1 %1852 }
 0xb94   :  { %v1879_v56 = vsel %vm1025_vm0, %v1842_v30, %v1853_v53 }
 0xb95   :  { %v1861_v54 = vpop.permute.xlu0 %1860 }
 0xb97   :  { %v1857_v37 = vpop.permute.xlu1 %1856 }
 0xb98   :  { %v1880_v57 = vsel %vm1112_vm4, %v1879_v56, %v1857_v37 }
 0xb99   :  { %v1882_v42 = vsel %vm1881_vm1, %v1880_v57, %v1861_v54  ;;  %v1877_v63 = vpop.permute.xlu0 %1876 }
 0xb9a   :  { %v1884_v59 = vsel %vm1883_vm7, %v1882_v42, %v1865_v35 }
 0xb9b   :  { %v1886_v60 = vsel %vm1885_vm8, %v1884_v59, %v1869_v52  ;;  %v1873_v61 = vpop.permute.xlu1 %1872 }
 0xb9c   :  { %v1888_v44 = vsel %vm1887_vm9, %v1886_v60, %v1873_v61 }
 0xb9d   :  { %v1890_v0 = vsel %vm1889_vm10, %v1888_v44, %v1877_v63 }
 0xb9e   :  { %1891 = vst [vmem:[#allocation2] sm:$0x3] %v1890_v0 }
 0xb9f   :  { %2575 = shalt.err (!%p2572_p4)
}
 0xba0   :  { %s2576_s26 = scalar_lea.hbm %s3246_s11, 32 }
 0xba1   :  { %p2577_p5 = scmp.ne.s32.totalorder %s3246_s11, %s2576_s26  ;;  %p2580_p6 = scmp.lt.u32.totalorder %s2576_s26, %s3246_s11 }
 0xba3   :  { %p2582_p7 = pnand %p2580_p6, %p2577_p5 }
 0xba5   :  { %2585 = shalt.err (!%p2582_p7)
}
 0xba6   :  { %1901 = dma.vmem_to_hbm [thread:$0]  %s1899_s5, 32, %s3246_s11, [#allocation3]  }
 0xba7   :  { %2586 = dma.done.wait [#allocation3], 32  }
 0xba8   :  { %2587 = vsyncadd [#allocation3], 4294967264 }
 0xba9   :  { %1905 = vsyncpa [#allocation3], 1 }

</bundles_post_ra>
